<compile_context>
chip_gen: v7x
topology: tpu7x:2x2x1
jax: 0.10.0
libtpu: 0.0.40
codegen_flags: <defaults>
</compile_context>

<pallas_src>
import functools

import jax
import jax.numpy as jnp
from jax.experimental import pallas as pl
from jax.experimental.pallas import tpu as pltpu


def _round_up(a, b):
    return (a + b - 1) // b * b


# ---------------------------------------------------------------------------
# One-time parameter prep (hoisted out of the per-call forward path)
# ---------------------------------------------------------------------------
def prepare_embedfc_params(w1, b1, w2, b2, *, compute_dtype=jnp.bfloat16):
    """Prepares EmbedFC parameters for the Pallas kernel.

    w1: (embed_dim, input_dim) torch Linear weight    b1: (embed_dim,)
    w2: (embed_dim, embed_dim)                        b2: (embed_dim,)

    Returns (w1t, w2t, bpack, embed_dim) where:
      w1t  : (input_dim, Dp) weights pre-transposed, cast to compute_dtype
      w2t  : (Dp, Dp)
      bpack: (2, Dp) f32, both biases packed into one small array
      Dp   : embed_dim zero-padded up to a multiple of 128 (lane-dense output).
    Zero padding is exact: padded hidden units are silu(0)=0 and the padded
    w2 rows/cols are zero, so padded output columns are exactly 0.
    """
    embed_dim, input_dim = w1.shape
    dp = _round_up(embed_dim, 128)

    w1t = jnp.zeros((input_dim, dp), compute_dtype)
    w1t = w1t.at[:, :embed_dim].set(jnp.transpose(w1).astype(compute_dtype))

    w2t = jnp.zeros((dp, dp), compute_dtype)
    w2t = w2t.at[:embed_dim, :embed_dim].set(jnp.transpose(w2).astype(compute_dtype))

    bpack = jnp.zeros((2, dp), jnp.float32)
    bpack = bpack.at[0, :embed_dim].set(b1.astype(jnp.float32))
    bpack = bpack.at[1, :embed_dim].set(b2.astype(jnp.float32))
    return w1t, w2t, bpack, embed_dim


# ---------------------------------------------------------------------------
# Pallas kernel: fused Linear -> SiLU -> Linear on one row tile
# ---------------------------------------------------------------------------
def _embedfc_kernel(x_ref, w1_ref, w2_ref, b_ref, out_ref, *, approx_silu):
    w_dtype = w1_ref.dtype
    # In-kernel cast of x to the matmul dtype (hidden under the MXU, no extra
    # HBM pass in the wrapper).
    x = x_ref[...].astype(w_dtype)                                    # (tm, Din)
    b = b_ref[...]                                                    # (2, Dp) f32

    # Linear 1 (+ bias) -- f32 accumulate on the MXU.
    h = jnp.dot(x, w1_ref[...], preferred_element_type=jnp.float32) + b[0:1, :]

    # SiLU: exp + reciprocal go to the EUP slot (off the VALU); approximate
    # reciprocal only when we are already on the reduced-precision bf16 path.
    sig = pl.reciprocal(1.0 + jnp.exp(-h), approx=approx_silu)
    s = h * sig

    # Linear 2 (+ bias) -- hidden activation never leaves vregs/VMEM.
    y = jnp.dot(s.astype(w_dtype), w2_ref[...],
                preferred_element_type=jnp.float32) + b[1:2, :]
    out_ref[...] = y.astype(out_ref.dtype)


# ---------------------------------------------------------------------------
# Forward wrapper (everything here is static shape logic; no extra HBM passes)
# ---------------------------------------------------------------------------
def embedfc_forward(x, w1t, w2t, bpack, *, embed_dim,
                    row_tile_cap=1024,
                    vmem_budget_bytes=48 * 1024 * 1024,
                    out_dtype=jnp.float32,
                    two_core_split=True):
    """Pallas EmbedFC forward: x.view(-1, input_dim) -> Linear -> SiLU -> Linear."""
    input_dim, dp = w1t.shape
    assert x.size % input_dim == 0, "x element count must be divisible by input_dim"
    x2d = x.reshape(-1, input_dim)                       # torch: x.view(-1, input_dim)
    m = x2d.shape[0]

    x_bytes = jnp.dtype(x2d.dtype).itemsize
    w_bytes = jnp.dtype(w1t.dtype).itemsize
    o_bytes = jnp.dtype(out_dtype).itemsize

    # Derive the row tile from a VMEM budget (weights + bias are grid-invariant
    # but conservatively counted double-buffered, like the x / out row tiles).
    invariant = 2 * (input_dim * dp + dp * dp) * w_bytes + 2 * 2 * dp * 4
    per_row = 2 * (input_dim * x_bytes + dp * o_bytes)
    avail = max(vmem_budget_bytes - invariant, 8 * per_row)
    tm = min(row_tile_cap, max(8, (avail // per_row) // 8 * 8))
    if two_core_split:
        # Give the "parallel" row axis >= 2 steps so v7x's 2 TCs both work.
        tm = min(tm, _round_up(pl.cdiv(m, 2), 8))
    if tm >= 256:
        tm = tm // 256 * 256                 # match the 2x256^2 MXU tile
    if m <= tm:
        tm = m                               # single full-extent block, no masking
    grid = (pl.cdiv(m, tm),)                 # partial last tile: reads clipped, writes masked

    kernel = functools.partial(
        _embedfc_kernel, approx_silu=(w1t.dtype == jnp.bfloat16))

    out = pl.pallas_call(
        kernel,
        out_shape=jax.ShapeDtypeStruct((m, dp), out_dtype),
        grid=grid,
        in_specs=[
            pl.BlockSpec((tm, input_dim), lambda i: (i, 0)),
            pl.BlockSpec(w1t.shape, lambda i: (0, 0)),    # grid-invariant
            pl.BlockSpec(w2t.shape, lambda i: (0, 0)),    # grid-invariant
            pl.BlockSpec(bpack.shape, lambda i: (0, 0)),  # grid-invariant
        ],
        out_specs=pl.BlockSpec((tm, dp), lambda i: (i, 0)),
        compiler_params=pltpu.CompilerParams(
            dimension_semantics=("parallel",),
            vmem_limit_bytes=int(vmem_budget_bytes)),
    )(x2d, w1t, w2t, bpack)

    # Single slice back to the true embed_dim (only if it was padded to 128).
    return out if dp == embed_dim else out[:, :embed_dim]


# ---------------------------------------------------------------------------
# Pure-JAX reference for verification
# ---------------------------------------------------------------------------
def ref_forward(x, w1, b1, w2, b2):
    x2d = x.reshape(-1, w1.shape[1])
    h = jnp.dot(x2d, w1.T, precision=jax.lax.Precision.HIGHEST) + b1
    s = h * jax.nn.sigmoid(h)
    return jnp.dot(s, w2.T, precision=jax.lax.Precision.HIGHEST) + b2


# ---------------------------------------------------------------------------
if __name__ == "__main__":
    B, INPUT_DIM, EMBED_DIM = 2, 4, 32

    key = jax.random.PRNGKey(0)
    k = jax.random.split(key, 5)
    x = jax.random.normal(k[0], (B, INPUT_DIM), jnp.float32)
    w1 = 0.3 * jax.random.normal(k[1], (EMBED_DIM, INPUT_DIM), jnp.float32)
    b1 = 0.1 * jax.random.normal(k[2], (EMBED_DIM,), jnp.float32)
    w2 = 0.3 * jax.random.normal(k[3], (EMBED_DIM, EMBED_DIM), jnp.float32)
    b2 = 0.1 * jax.random.normal(k[4], (EMBED_DIM,), jnp.float32)

    ref = ref_forward(x, w1, b1, w2, b2)

    # --- f32-exact path (tight tolerance) ----------------------------------
    w1t32, w2t32, bp32, D = prepare_embedfc_params(
        w1, b1, w2, b2, compute_dtype=jnp.float32)
    fwd_f32 = jax.jit(functools.partial(embedfc_forward, embed_dim=D))
    out_f32 = fwd_f32(x, w1t32, w2t32, bp32)
    jax.block_until_ready(out_f32)
    assert out_f32.shape == (B, EMBED_DIM), out_f32.shape
    assert jnp.allclose(out_f32, ref, rtol=1e-4, atol=1e-4), \
        f"f32 path max abs err {jnp.max(jnp.abs(out_f32 - ref))}"

    # --- bf16 matmul path (default; f32 accumulate, looser tolerance) ------
    w1tb, w2tb, bpb, D = prepare_embedfc_params(w1, b1, w2, b2)  # bf16 default
    fwd_bf16 = jax.jit(functools.partial(embedfc_forward, embed_dim=D))
    out_bf16 = fwd_bf16(x, w1tb, w2tb, bpb)
    jax.block_until_ready(out_bf16)
    assert out_bf16.shape == (B, EMBED_DIM), out_bf16.shape
    assert jnp.allclose(out_bf16, ref, rtol=5e-2, atol=5e-2), \
        f"bf16 path max abs err {jnp.max(jnp.abs(out_bf16 - ref))}"

    print("KERNEL_OK")
</pallas_src>

<mosaic_0001>
module attributes {stable_mosaic.version = 11 : i64} {
  func.func @_embedfc_kernel(%arg0: i32, %arg1: memref<2x4xf32, #tpu.memory_space<vmem>>, %arg2: memref<4x128xf32, #tpu.memory_space<vmem>>, %arg3: memref<128x128xf32, #tpu.memory_space<vmem>>, %arg4: memref<2x128xf32, #tpu.memory_space<vmem>>, %arg5: memref<2x128xf32, #tpu.memory_space<vmem>>) attributes {dimension_semantics = [#tpu.dimension_semantics<parallel>], iteration_bounds = array<i64: 1>, scalar_prefetch = 0 : i64, scratch_operands = 0 : i64, tpu.core_type = #tpu.core_type<tc>, window_params = [{transform_indices = @transform_0, window_bounds = array<i64: 2, 4>}, {pipeline_mode = #tpu.pipeline_mode<synchronous>, transform_indices = @transform_1, window_bounds = array<i64: 4, 128>}, {pipeline_mode = #tpu.pipeline_mode<synchronous>, transform_indices = @transform_2, window_bounds = array<i64: 128, 128>}, {pipeline_mode = #tpu.pipeline_mode<synchronous>, transform_indices = @transform_3, window_bounds = array<i64: 2, 128>}, {transform_indices = @transform_4, window_bounds = array<i64: 2, 128>}]} {
    %c0 = arith.constant 0 : index
    %c0_0 = arith.constant 0 : index
    %0 = vector.load %arg1[%c0, %c0_0] : memref<2x4xf32, #tpu.memory_space<vmem>>, vector<2x4xf32>
    %c0_1 = arith.constant 0 : index
    %c0_2 = arith.constant 0 : index
    %1 = vector.load %arg4[%c0_1, %c0_2] : memref<2x128xf32, #tpu.memory_space<vmem>>, vector<2x128xf32>
    %c0_3 = arith.constant 0 : index
    %c0_4 = arith.constant 0 : index
    %2 = vector.load %arg2[%c0_3, %c0_4] : memref<4x128xf32, #tpu.memory_space<vmem>>, vector<4x128xf32>
    %cst = arith.constant dense<0.000000e+00> : vector<2x128xf32>
    %3 = tpu.matmul %0, %2, %cst {dimension_numbers = #tpu.dot_dimension_numbers<[1], [0], [0], [1], [0, 0, 1, 1], [], []>} : vector<2x4xf32>, vector<4x128xf32>, vector<2x128xf32> -> vector<2x128xf32>
    %4 = vector.extract_strided_slice %1 {offsets = [0, 0], sizes = [1, 128], strides = [1, 1]} : vector<2x128xf32> to vector<1x128xf32>
    %5 = vector.broadcast %4 : vector<1x128xf32> to vector<2x128xf32>
    %6 = arith.addf %3, %5 : vector<2x128xf32>
    %cst_5 = arith.constant 0.000000e+00 : f32
    %7 = vector.broadcast %cst_5 : f32 to vector<2x128xf32>
    %8 = arith.subf %7, %6 : vector<2x128xf32>
    %9 = math.exp %8 : vector<2x128xf32>
    %cst_6 = arith.constant 1.000000e+00 : f32
    %10 = vector.broadcast %cst_6 : f32 to vector<2x128xf32>
    %11 = arith.addf %10, %9 : vector<2x128xf32>
    %12 = tpu.reciprocal %11 : vector<2x128xf32> -> vector<2x128xf32>
    %13 = arith.mulf %6, %12 : vector<2x128xf32>
    %c0_7 = arith.constant 0 : index
    %c0_8 = arith.constant 0 : index
    %14 = vector.load %arg3[%c0_7, %c0_8] : memref<128x128xf32, #tpu.memory_space<vmem>>, vector<128x128xf32>
    %cst_9 = arith.constant dense<0.000000e+00> : vector<2x128xf32>
    %15 = tpu.matmul %13, %14, %cst_9 {dimension_numbers = #tpu.dot_dimension_numbers<[1], [0], [0], [1], [0, 0, 1, 1], [], []>} : vector<2x128xf32>, vector<128x128xf32>, vector<2x128xf32> -> vector<2x128xf32>
    %16 = vector.extract_strided_slice %1 {offsets = [1, 0], sizes = [1, 128], strides = [1, 1]} : vector<2x128xf32> to vector<1x128xf32>
    %17 = vector.broadcast %16 : vector<1x128xf32> to vector<2x128xf32>
    %18 = arith.addf %15, %17 : vector<2x128xf32>
    %c0_10 = arith.constant 0 : index
    %c0_11 = arith.constant 0 : index
    %19 = vector.load %arg5[%c0_10, %c0_11] : memref<2x128xf32, #tpu.memory_space<vmem>>, vector<2x128xf32>
    tpu.vector_store %arg5[%c0_10, %c0_11], %18 {strides = array<i32>} : memref<2x128xf32, #tpu.memory_space<vmem>>, vector<2x128xf32>,
    return
  }
  func.func @transform_0(%arg0: i32) -> (i32, i32) {
    %c0_i32 = arith.constant 0 : i32
    %c0_i32_0 = arith.constant 0 : i32
    return %arg0, %c0_i32 : i32, i32
  }
  func.func @transform_1(%arg0: i32) -> (i32, i32) {
    %c0_i32 = arith.constant 0 : i32
    %c0_i32_0 = arith.constant 0 : i32
    %c0_i32_1 = arith.constant 0 : i32
    return %c0_i32, %c0_i32_0 : i32, i32
  }
  func.func @transform_2(%arg0: i32) -> (i32, i32) {
    %c0_i32 = arith.constant 0 : i32
    %c0_i32_0 = arith.constant 0 : i32
    %c0_i32_1 = arith.constant 0 : i32
    return %c0_i32, %c0_i32_0 : i32, i32
  }
  func.func @transform_3(%arg0: i32) -> (i32, i32) {
    %c0_i32 = arith.constant 0 : i32
    %c0_i32_0 = arith.constant 0 : i32
    %c0_i32_1 = arith.constant 0 : i32
    return %c0_i32, %c0_i32_0 : i32, i32
  }
  func.func @transform_4(%arg0: i32) -> (i32, i32) {
    %c0_i32 = arith.constant 0 : i32
    %c0_i32_0 = arith.constant 0 : i32
    return %arg0, %c0_i32 : i32, i32
  }
}

</mosaic_0001>

<bundles_post_ra>
// kernel: embedfc_forward.1
= control target key start
LH: loop header
LB: loop body
LE: loop exit
PB: predicated region body
PF: predicated region fallthrough
CT: control target
= control target key end

     0   :  { %9 = vsyncpa [#allocation3], 0  ;;  %s530_s0 = inlined_call_operand.hbm [shape: f32[2,4], index: 0, kind: input, shape index: {}]   ;;  %s531_s1 = inlined_call_operand.hbm [shape: f32[4,128], index: 1, kind: input, shape index: {}]   ;;  %s532_s2 = inlined_call_operand.hbm [shape: f32[128,128], index: 2, kind: input, shape index: {}]   ;;  %s533_s3 = inlined_call_operand.vmem [shape: f32[2,128], index: 3, kind: input, shape index: {}]   ;;  %s534_s4 = inlined_call_operand.hbm [shape: f32[2,128], index: 4, kind: output, shape index: {}]  }
   0x1   :  { %10 = vsyncpa [#allocation6], 0 }
   0x2   :  { %11 = vsyncpa [#allocation4], 0  ;;  %s445_s15 = smov [#allocation5]   ;;  %s446_s17 = smov [#allocation2]  }
   0x3   :  { %s28_s16 = sshll.u32 %s445_s15, 4  ;;  %s18_s18 = sshll.u32 %s446_s17, 4  ;;  %s29_s16 = int_to_ptr.vmem [resolvable:$true] %s28_s16  ;;  %s19_s18 = int_to_ptr.vmem [resolvable:$true] %s18_s18 }
   0x4   :  { %s351_s21 = scalar_lea.hbm %s531_s1, 64 }
   0x5   :  { %p352_p0 = scmp.ne.s32.totalorder %s531_s1, %s351_s21  ;;  %p355_p1 = scmp.lt.u32.totalorder %s351_s21, %s531_s1 }
   0x7   :  { %p357_p2 = pnand %p355_p1, %p352_p0 }
   0x9   :  { %360 = shalt.err (!%p357_p2)
}
   0xa   :  { %s361_s26 = scalar_lea.vmem %s29_s16, 64  ;;  %p366_p4 = scmp.lt.s32.totalorder %s29_s16, %s29_s16 }
   0xb   :  { %p362_p3 = scmp.ne.s32.totalorder %s29_s16, %s361_s26  ;;  %p367_p5 = scmp.lt.s32.totalorder %s361_s26, %s361_s26 }
   0xd   :  { %p368_p6 = por %p367_p5, %p366_p4 }
   0xf   :  { %p369_p7 = pnand %p368_p6, %p362_p3 }
  0x11   :  { %372 = shalt.err (!%p369_p7)
}
  0x12   :  { %31 = dma.hbm_to_vmem [thread:$0]  %s531_s1, 64, %s29_s16, [#allocation6]  }
  0x13   :  { %s373_s5 = scalar_lea.hbm %s530_s0, 32 }
  0x14   :  { %p374_p8 = scmp.ne.s32.totalorder %s530_s0, %s373_s5  ;;  %p377_p9 = scmp.lt.u32.totalorder %s373_s5, %s530_s0 }
  0x16   :  { %p379_p10 = pnand %p377_p9, %p374_p8 }
  0x18   :  { %382 = shalt.err (!%p379_p10)
}
  0x19   :  { %s383_s10 = scalar_lea.vmem %s19_s18, 32  ;;  %p388_p12 = scmp.lt.s32.totalorder %s19_s18, %s19_s18 }
  0x1a   :  { %p384_p11 = scmp.ne.s32.totalorder %s19_s18, %s383_s10  ;;  %p389_p13 = scmp.lt.s32.totalorder %s383_s10, %s383_s10 }
  0x1c   :  { %p390_p0 = por %p389_p13, %p388_p12 }
  0x1e   :  { %p391_p1 = pnand %p390_p0, %p384_p11 }
  0x20   :  { %394 = shalt.err (!%p391_p1)
}
  0x21   :  { %21 = dma.hbm_to_vmem [thread:$0]  %s530_s0, 32, %s19_s18, [#allocation3]  }
  0x22   :  { %s447_s12 = smov [#allocation7]   ;;  %s395_s16 = scalar_lea.hbm %s532_s2, 2048 }
  0x23   :  { %s37_s13 = sshll.u32 %s447_s12, 4  ;;  %p396_p2 = scmp.ne.s32.totalorder %s532_s2, %s395_s16  ;;  %s38_s13 = int_to_ptr.vmem [resolvable:$true] %s37_s13 }
  0x24   :  { %p399_p3 = scmp.lt.u32.totalorder %s395_s16, %s532_s2 }
  0x26   :  { %p401_p4 = pnand %p399_p3, %p396_p2 }
  0x28   :  { %404 = shalt.err (!%p401_p4)
}
  0x29   :  { %s405_s22 = scalar_lea.vmem %s38_s13, 2048  ;;  %p410_p6 = scmp.lt.s32.totalorder %s38_s13, %s38_s13 }
  0x2a   :  { %p406_p5 = scmp.ne.s32.totalorder %s38_s13, %s405_s22  ;;  %p411_p7 = scmp.lt.s32.totalorder %s405_s22, %s405_s22 }
  0x2c   :  { %p412_p8 = por %p411_p7, %p410_p6 }
  0x2e   :  { %p413_p9 = pnand %p412_p8, %p406_p5 }
  0x30   :  { %416 = shalt.err (!%p413_p9)
}
  0x31   :  { %s448_s0 = smov 128   ;;  %s449_s18 = smov 8  }
  0x32   :  { %43 = dma.hbm_to_vmem [thread:$0]  %s532_s2, 2048, %s38_s13, [#allocation6], %s448_s0, %s448_s0, %s449_s18  }
  0x33   :  { %439 = dma.done.wait [#allocation3], 32  }
  0x34   :  { %440 = vsyncadd [#allocation3], 4294967264 }
  0x35   :  { %441 = dma.done.wait [#allocation6], 2112  }
  0x36   :  { %442 = vsyncadd [#allocation6], 4294965184  ;;  %v450_v0 = vmov 0.0   ;;  %vm451_vm0 = vmmov 0   ;;  %vm66_vm1 = vcmask 1043456   ;;  %vm62_vm2 = vcmask 31744  }
  0x37   :  { %274 = vmatprep.subr.mxu0 %v450_v0  ;;  %276 = vmatprep.mubr.msk.f32.mxu0 %vm451_vm0, %v450_v0  ;;  %v57_v1 = vld [vmem:[#allocation5] sm:$0xf]  ;;  %v55_v2 = vld [vmem:[#allocation2] sm:$0x3]  ;;  %v146_v3 = vld [vmem:[#allocation7] sm:$0xff]  ;;  %v452_v6 = vmov 0.0|0.0   ;;  %v58_v28 = vlaneseq }
  0x38   :  { %311 = vmatprep.mubr.msk.f32.mxu1 %vm451_vm0, %v450_v0  ;;  %275 = vmatpush3.msk.msra.mxu0 %vm66_vm1, %v57_v1  ;;  %v147_v4 = vld [vmem:[#allocation7 + $0x8] sm:$0xff]  ;;  %v148_v7 = vld [vmem:[#allocation7 + $0x10] sm:$0xff]  ;;  %v149_v8 = vld [vmem:[#allocation7 + $0x18] sm:$0xff]  ;;  %s453_s26 = smov [#allocation8]  }
  0x39   :  { %277 = vmatmul.mubr.msk.f32.vlgmr.msra.gmra.mrb[0].mxu0 %vm62_vm2, %v55_v2  ;;  %v315_v5 = vpack.c.bf16 %v147_v4, %v146_v3  ;;  %314 = vmatprep.subr.bf16.mxu1 %v452_v6  ;;  %v318_v9 = vpack.c.bf16 %v149_v8, %v148_v7  ;;  %v150_v10 = vld [vmem:[#allocation7 + $0x20] sm:$0xff]  ;;  %v151_v11 = vld [vmem:[#allocation7 + $0x28] sm:$0xff]  ;;  %v152_v13 = vld [vmem:[#allocation7 + $0x30] sm:$0xff]  ;;  %v59_v29 = vshrl.u32 %v58_v28, 7  ;;  %s243_s27 = sshll.u32 %s453_s26, 4  ;;  %s244_s27 = int_to_ptr.vmem [resolvable:$true] %s243_s27 }
  0x3a   :  { %v321_v12 = vpack.c.bf16 %v151_v11, %v150_v10  ;;  %v153_v14 = vld [vmem:[#allocation7 + $0x38] sm:$0xff]  ;;  %v154_v16 = vld [vmem:[#allocation7 + $0x40] sm:$0xff]  ;;  %v155_v17 = vld [vmem:[#allocation7 + $0x48] sm:$0xff]  ;;  %p422_p11 = scmp.lt.s32.totalorder %s244_s27, %s244_s27 }
  0x3b   :  { %316 = vmatpush3.bf16.msra.mxu1 %v315_v5  ;;  %v324_v15 = vpack.c.bf16 %v153_v14, %v152_v13  ;;  %v327_v18 = vpack.c.bf16 %v155_v17, %v154_v16  ;;  %v156_v19 = vld [vmem:[#allocation7 + $0x50] sm:$0xff]  ;;  %v157_v20 = vld [vmem:[#allocation7 + $0x58] sm:$0xff]  ;;  %v158_v22 = vld [vmem:[#allocation7 + $0x60] sm:$0xff]  ;;  %v60_v30 = vsub.s32 0, %v59_v29  ;;  %v164_v42 = vsub.s32 1, %v59_v29 }
  0x3c   :  { %317 = vmatprep.subr.bf16.mxu1 %v452_v6  ;;  %v330_v21 = vpack.c.bf16 %v157_v20, %v156_v19  ;;  %v159_v23 = vld [vmem:[#allocation7 + $0x68] sm:$0xff]  ;;  %v160_v25 = vld [vmem:[#allocation7 + $0x70] sm:$0xff]  ;;  %v161_v26 = vld [vmem:[#allocation7 + $0x78] sm:$0xff] }
  0x3d   :  { %v333_v24 = vpack.c.bf16 %v159_v23, %v158_v22  ;;  %v336_v27 = vpack.c.bf16 %v161_v26, %v160_v25  ;;  %v56_v31 = vld [vmem:[%s533_s3] sm:$0x3]  ;;  %s417_s3 = scalar_lea.vmem %s244_s27, 32 }
  0x3e   :  { %v61_v32 = vrot.slane %v56_v31, %v60_v30  ;;  %v165_v43 = vrot.slane %v56_v31, %v164_v42  ;;  %p418_p10 = scmp.ne.s32.totalorder %s244_s27, %s417_s3  ;;  %p423_p12 = scmp.lt.s32.totalorder %s417_s3, %s417_s3 }
  0x3f   :  { %319 = vmatpush3.bf16.msra.mxu1 %v318_v9 }
  0x40   :  { %320 = vmatprep.subr.bf16.mxu1 %v452_v6  ;;  %p424_p13 = por %p423_p12, %p422_p11 }
  0x42   :  { %p425_p0 = pnand %p424_p13, %p418_p10 }
  0x43   :  { %322 = vmatpush3.bf16.msra.mxu1 %v321_v12 }
  0x44   :  { %323 = vmatprep.subr.bf16.mxu1 %v452_v6 }
  0x47   :  { %325 = vmatpush3.bf16.msra.mxu1 %v324_v15 }
  0x48   :  { %326 = vmatprep.subr.bf16.mxu1 %v452_v6 }
  0x4b   :  { %328 = vmatpush3.bf16.msra.mxu1 %v327_v18 }
  0x4c   :  { %329 = vmatprep.subr.bf16.mxu1 %v452_v6 }
  0x4f   :  { %331 = vmatpush3.bf16.msra.mxu1 %v330_v21 }
  0x50   :  { %332 = vmatprep.subr.bf16.mxu1 %v452_v6 }
  0x53   :  { %334 = vmatpush3.bf16.msra.mxu1 %v333_v24 }
  0x54   :  { %335 = vmatprep.subr.bf16.mxu1 %v452_v6 }
  0x57   :  { %337 = vmatpush3.bf16.msra.mxu1 %v336_v27 }
 0x10c   :  { %v136_v33 = vpop.f32.mrb[0].mxu0 }
 0x10d   :  { %v137_v34 = vadd.f32 %v136_v33, %v61_v32  ;;  %v278_v35 = vpop.f32.mrb[1].mxu0 }
 0x10f   :  { %v140_v36 = vsub.f32 0.0, %v137_v34 }
 0x111   :  { %v141_v37 = vmul.f32 1.442695, %v140_v36 }
 0x113   :  { %347 = vpow2.f32 %v141_v37 }
 0x11d   :  { %v348_v38 = vpop.eup %347 }
 0x11e   :  { %v143_v39 = vadd.f32 1.0, %v348_v38 }
 0x120   :  { %349 = vrcp.f32 %v143_v39 }
 0x12a   :  { %v350_v40 = vpop.eup %349 }
 0x12b   :  { %v145_v41 = vmul.f32 %v350_v40, %v137_v34 }
 0x12d   :  { %312 = vmatmul.mubr.f32.vlgmr.msra.gmra.mrb[0].mxu1 %v145_v41 }
 0x200   :  { %v232_v44 = vpop.f32.mrb[0].mxu1 }
 0x201   :  { %v233_v45 = vadd.f32 %v232_v44, %v165_v43  ;;  %v313_v46 = vpop.f32.mrb[1].mxu1 }
 0x203   :  { %236 = vst [vmem:[#allocation8] sm:$0x3] %v233_v45 }
 0x204   :  { %428 = shalt.err (!%p425_p0)
}
 0x205   :  { %s429_s30 = scalar_lea.hbm %s534_s4, 32 }
 0x206   :  { %p430_p1 = scmp.ne.s32.totalorder %s534_s4, %s429_s30  ;;  %p433_p2 = scmp.lt.u32.totalorder %s429_s30, %s534_s4 }
 0x208   :  { %p435_p3 = pnand %p433_p2, %p430_p1 }
 0x20a   :  { %438 = shalt.err (!%p435_p3)
}
 0x20b   :  { %246 = dma.vmem_to_hbm [thread:$0]  %s244_s27, 32, %s534_s4, [#allocation4]  }
 0x20c   :  { %443 = dma.done.wait [#allocation4], 32  }
 0x20d   :  { %444 = vsyncadd [#allocation4], 4294967264 }
 0x20e   :  { %250 = vsyncpa [#allocation3], 1 }
 0x20f   :  { %251 = vsyncpa [#allocation6], 1 }
 0x210   :  { %252 = vsyncpa [#allocation4], 1 }

</bundles_post_ra>
